<compile_context>
chip_gen: v7x
topology: tpu7x:2x2x1
jax: 0.10.0
libtpu: 0.0.40
codegen_flags: <defaults>
</compile_context>

<pallas_src>
import functools
import math

import jax
import jax.numpy as jnp
from jax.experimental import pallas as pl
from jax.experimental.pallas import tpu as pltpu


def _round_up(x, m):
    return ((x + m - 1) // m) * m


def _wbce_partial_kernel(x_ref, t_ref, pwm1_ref, part_ref, *,
                         n_valid_rows, tile_rows, has_tail):
    """One grid step: loss on a (tile_rows, L) block -> (8, L) partial sum."""
    i = pl.program_id(0)

    x = x_ref[...].astype(jnp.float32)          # (tile_rows, L)
    t = t_ref[...].astype(jnp.float32)          # (tile_rows, L)
    pwm1 = pwm1_ref[...]                        # (1, L), f32, = pos_weight - 1

    nx = -x
    log_weight = 1.0 + pwm1 * t
    # Numerically stable softplus(-x): max(-x, 0) + log1p(exp(-|x|)),
    # with -|x| computed as min(x, -x) (saves the separate abs).
    sp_neg = jnp.maximum(nx, 0.0) + jnp.log1p(jnp.exp(jnp.minimum(x, nx)))
    loss = (1.0 - t) * x + log_weight * sp_neg  # (tile_rows, L)

    def fold(v):
        # Deferred reduction: fold sublane groups of 8 (pure VPU adds across
        # vregs); the tiny final cross-lane reduce + mean lives in the wrapper.
        return jnp.sum(v.reshape(tile_rows // 8, 8, v.shape[-1]), axis=0)

    if has_tail:
        last = pl.num_programs(0) - 1

        @pl.when(i != last)
        def _():
            part_ref[0] = fold(loss)

        @pl.when(i == last)
        def _():
            # Only the final (partial) block pays for the row mask.  The
            # out-of-bounds rows hold garbage, but jnp.where SELECTS (does not
            # multiply), so NaN/Inf there cannot leak into the sum.
            row = (jax.lax.broadcasted_iota(jnp.int32, loss.shape, 0)
                   + i * tile_rows)
            part_ref[0] = fold(jnp.where(row < n_valid_rows, loss, 0.0))
    else:
        part_ref[0] = fold(loss)


def weighted_bce_with_logits(inputs, targets, pos_weight=None, *,
                             tile_rows=None, cast_to_bf16=False):
    """Mean-reduced weighted BCE-with-logits.  inputs/targets: (N, C)."""
    N, C = inputs.shape
    total = N * C

    if not jnp.issubdtype(targets.dtype, jnp.floating):
        targets = targets.astype(jnp.float32)      # PyTorch's targets.float()
    if pos_weight is None:
        pwm1 = jnp.zeros((C,), dtype=jnp.float32)
    else:
        pwm1 = jnp.asarray(pos_weight, dtype=jnp.float32) - 1.0

    if cast_to_bf16:
        # Optional HBM-bound fast path (halves input bytes); kernel math is f32.
        inputs = inputs.astype(jnp.bfloat16)
        targets = targets.astype(jnp.bfloat16)

    # Lane-dense relayout when C is not a multiple of 128: (N, C) is contiguous,
    # so viewing it as (N*C/L, L) with L = lcm(C, 128) is a free reshape (no HBM
    # copy) and removes the 128/C lane-padding waste in VMEM/VPU and stores.
    x2, t2, pwm1_row, L = inputs, targets, pwm1, C
    if C % 128 != 0:
        lcm = C * 128 // math.gcd(C, 128)
        if lcm <= 8192 and total >= lcm and total % lcm == 0:
            L = lcm
            x2 = inputs.reshape(total // L, L)
            t2 = targets.reshape(total // L, L)
            pwm1_row = jnp.tile(pwm1, L // C)
    rows = x2.shape[0]
    pwm1_2d = pwm1_row.reshape(1, L)

    # Tile sizing: ~24 MiB working set = double-buffered x/t blocks plus ~4 f32
    # tile-sized temporaries, under an explicit 32 MiB scoped-VMEM limit.  Also
    # keep >= 4 grid blocks when possible so the "parallel" grid axis can be
    # split across v7x's two TensorCores (no-op on v5e/v6e).
    x_isz = jnp.dtype(x2.dtype).itemsize
    t_isz = jnp.dtype(t2.dtype).itemsize
    bytes_per_row = L * (2 * (x_isz + t_isz) + 4 * 4)
    vmem_budget = 24 * 1024 * 1024
    max_rows_vmem = max(8, (vmem_budget // bytes_per_row) // 8 * 8)
    target_rows = max(8, _round_up(pl.cdiv(rows, 4), 8))
    if tile_rows is None:
        tile_rows = min(max_rows_vmem, target_rows)
    tile_rows = max(8, _round_up(min(int(tile_rows), max_rows_vmem), 8))

    num_blocks = pl.cdiv(rows, tile_rows)
    has_tail = (rows % tile_rows) != 0

    kernel = functools.partial(
        _wbce_partial_kernel,
        n_valid_rows=rows, tile_rows=tile_rows, has_tail=has_tail)

    partials = pl.pallas_call(
        kernel,
        out_shape=jax.ShapeDtypeStruct((num_blocks, 8, L), jnp.float32),
        grid_spec=pltpu.PrefetchScalarGridSpec(
            num_scalar_prefetch=0,
            grid=(num_blocks,),
            in_specs=[
                pl.BlockSpec((tile_rows, L), lambda i: (i, 0)),
                pl.BlockSpec((tile_rows, L), lambda i: (i, 0)),
                pl.BlockSpec((1, L), lambda i: (0, 0)),   # resident pos_weight-1
            ],
            out_specs=pl.BlockSpec((1, 8, L), lambda i: (i, 0, 0)),
        ),
        compiler_params=pltpu.CompilerParams(
            dimension_semantics=("parallel",),            # independent blocks
            vmem_limit_bytes=32 * 1024 * 1024,            # explicit, all gens
        ),
    )(x2, t2, pwm1_2d)

    # Tiny final reduction + mean over the TRUE element count.
    return jnp.sum(partials, dtype=jnp.float32) / jnp.float32(total)


class WeightedBCEWithLogitsLoss:
    """Analogue of the PyTorch module (default 'mean' reduction only)."""

    def __init__(self, pos_weight=None):
        self.pos_weight = pos_weight

    def __call__(self, inputs, targets):
        return weighted_bce_with_logits(inputs, targets, self.pos_weight)


def _reference(inputs, targets, pos_weight):
    if pos_weight is None:
        pos_weight = jnp.ones((inputs.shape[1],), jnp.float32)
    lw = 1.0 + (pos_weight[None, :] - 1.0) * targets
    sp_neg = jnp.maximum(-inputs, 0.0) + jnp.log1p(jnp.exp(-jnp.abs(inputs)))
    return jnp.mean((1.0 - targets) * inputs + lw * sp_neg)


if __name__ == "__main__":
    key = jax.random.PRNGKey(0)
    k1, k2, k3 = jax.random.split(key, 3)

    # 1) Aligned case (C multiple of 128).
    N, C = 16, 128
    x = jax.random.normal(k1, (N, C), dtype=jnp.float32)
    t = (jax.random.uniform(k2, (N, C)) > 0.5).astype(jnp.float32)
    pw = 0.5 + jax.random.uniform(k3, (C,), dtype=jnp.float32)
    loss = jax.block_until_ready(WeightedBCEWithLogitsLoss(pw)(x, t))
    ref = _reference(x, t, pw)
    assert jnp.allclose(loss, ref, atol=1e-5, rtol=1e-5), (loss, ref)

    # 2) Ragged N (partial final block, no jnp.pad) + pos_weight=None path.
    N2 = 10
    x2 = jax.random.normal(k1, (N2, C), dtype=jnp.float32)
    t2 = (jax.random.uniform(k2, (N2, C)) > 0.5).astype(jnp.float32)
    loss2 = jax.block_until_ready(
        weighted_bce_with_logits(x2, t2, pw, tile_rows=16))
    ref2 = _reference(x2, t2, pw)
    assert jnp.allclose(loss2, ref2, atol=1e-5, rtol=1e-5), (loss2, ref2)
    loss2n = jax.block_until_ready(weighted_bce_with_logits(x2, t2, None))
    ref2n = _reference(x2, t2, None)
    assert jnp.allclose(loss2n, ref2n, atol=1e-5, rtol=1e-5), (loss2n, ref2n)

    # 3) Small C (lane-dense relayout: (12, 32) viewed as (3, 128)).
    N3, C3 = 12, 32
    x3 = jax.random.normal(k1, (N3, C3), dtype=jnp.float32)
    t3 = (jax.random.uniform(k2, (N3, C3)) > 0.5).astype(jnp.float32)
    pw3 = 0.5 + jax.random.uniform(k3, (C3,), dtype=jnp.float32)
    loss3 = jax.block_until_ready(weighted_bce_with_logits(x3, t3, pw3))
    ref3 = _reference(x3, t3, pw3)
    assert jnp.allclose(loss3, ref3, atol=1e-5, rtol=1e-5), (loss3, ref3)

    print("KERNEL_OK")
</pallas_src>

<mosaic_0001>
module attributes {stable_mosaic.version = 11 : i64} {
  func.func @_wbce_partial_kernel(%arg0: i32, %arg1: memref<8x128xf32, #tpu.memory_space<vmem>>, %arg2: memref<8x128xf32, #tpu.memory_space<vmem>>, %arg3: memref<1x128xf32, #tpu.memory_space<vmem>>, %arg4: memref<1x8x128xf32, #tpu.memory_space<vmem>>) attributes {dimension_semantics = [#tpu.dimension_semantics<parallel>], iteration_bounds = array<i64: 2>, scalar_prefetch = 0 : i64, scratch_operands = 0 : i64, tpu.core_type = #tpu.core_type<tc>, window_params = [{transform_indices = @transform_0, window_bounds = array<i64: 8, 128>}, {transform_indices = @transform_1, window_bounds = array<i64: 8, 128>}, {pipeline_mode = #tpu.pipeline_mode<synchronous>, transform_indices = @transform_2, window_bounds = array<i64: 1, 128>}, {transform_indices = @transform_3, window_bounds = array<i64: 1, 8, 128>}]} {
    %c0 = arith.constant 0 : index
    %c0_0 = arith.constant 0 : index
    %0 = vector.load %arg1[%c0, %c0_0] : memref<8x128xf32, #tpu.memory_space<vmem>>, vector<8x128xf32>
    %c0_1 = arith.constant 0 : index
    %c0_2 = arith.constant 0 : index
    %1 = vector.load %arg2[%c0_1, %c0_2] : memref<8x128xf32, #tpu.memory_space<vmem>>, vector<8x128xf32>
    %c0_3 = arith.constant 0 : index
    %c0_4 = arith.constant 0 : index
    %2 = vector.load %arg3[%c0_3, %c0_4] : memref<1x128xf32, #tpu.memory_space<vmem>>, vector<1x128xf32>
    %cst = arith.constant 0.000000e+00 : f32
    %3 = vector.broadcast %cst : f32 to vector<8x128xf32>
    %4 = arith.subf %3, %0 : vector<8x128xf32>
    %5 = vector.broadcast %2 : vector<1x128xf32> to vector<8x128xf32>
    %6 = arith.mulf %5, %1 : vector<8x128xf32>
    %cst_5 = arith.constant 1.000000e+00 : f32
    %7 = vector.broadcast %cst_5 : f32 to vector<8x128xf32>
    %8 = arith.addf %7, %6 : vector<8x128xf32>
    %cst_6 = arith.constant 0.000000e+00 : f32
    %9 = vector.broadcast %cst_6 : f32 to vector<8x128xf32>
    %10 = arith.maximumf %4, %9 : vector<8x128xf32>
    %11 = arith.minimumf %0, %4 : vector<8x128xf32>
    %12 = math.exp %11 : vector<8x128xf32>
    %13 = math.log1p %12 : vector<8x128xf32>
    %14 = arith.addf %10, %13 : vector<8x128xf32>
    %cst_7 = arith.constant 1.000000e+00 : f32
    %15 = vector.broadcast %cst_7 : f32 to vector<8x128xf32>
    %16 = arith.subf %15, %1 : vector<8x128xf32>
    %17 = arith.mulf %16, %0 : vector<8x128xf32>
    %18 = arith.mulf %8, %14 : vector<8x128xf32>
    %19 = arith.addf %17, %18 : vector<8x128xf32>
    %20 = vector.shape_cast %19 : vector<8x128xf32> to vector<1x8x128xf32>
    %cst_8 = arith.constant dense<0.000000e+00> : vector<8x128xf32>
    %21 = vector.multi_reduction <add>, %20, %cst_8 [0] : vector<1x8x128xf32> to vector<8x128xf32>
    %c0_9 = arith.constant 0 : index
    %c0_10 = arith.constant 0 : index
    %c0_11 = arith.constant 0 : index
    %22 = vector.load %arg4[%c0_9, %c0_10, %c0_11] : memref<1x8x128xf32, #tpu.memory_space<vmem>>, vector<1x8x128xf32>
    %23 = vector.shape_cast %22 : vector<1x8x128xf32> to vector<8x128xf32>
    %24 = vector.shape_cast %21 : vector<8x128xf32> to vector<1x8x128xf32>
    tpu.vector_store %arg4[%c0_9, %c0_10, %c0_11], %24 {strides = array<i32>} : memref<1x8x128xf32, #tpu.memory_space<vmem>>, vector<1x8x128xf32>,
    return
  }
  func.func @transform_0(%arg0: i32) -> (i32, i32) {
    %c0_i32 = arith.constant 0 : i32
    %c0_i32_0 = arith.constant 0 : i32
    return %arg0, %c0_i32 : i32, i32
  }
  func.func @transform_1(%arg0: i32) -> (i32, i32) {
    %c0_i32 = arith.constant 0 : i32
    %c0_i32_0 = arith.constant 0 : i32
    return %arg0, %c0_i32 : i32, i32
  }
  func.func @transform_2(%arg0: i32) -> (i32, i32) {
    %c0_i32 = arith.constant 0 : i32
    %c0_i32_0 = arith.constant 0 : i32
    %c0_i32_1 = arith.constant 0 : i32
    return %c0_i32, %c0_i32_0 : i32, i32
  }
  func.func @transform_3(%arg0: i32) -> (i32, i32, i32) {
    %c0_i32 = arith.constant 0 : i32
    %c0_i32_0 = arith.constant 0 : i32
    %c0_i32_1 = arith.constant 0 : i32
    return %arg0, %c0_i32, %c0_i32_0 : i32, i32, i32
  }
}

</mosaic_0001>

<bundles_post_ra>
// kernel: tpu_custom_call.1
= control target key start
LH: loop header
LB: loop body
LE: loop exit
PB: predicated region body
PF: predicated region fallthrough
CT: control target
= control target key end

     0   :  { %8 = vsyncpa [#allocation3], 0  ;;  %s805_s0 = inlined_call_operand.hbm [shape: f32[16,128], index: 0, kind: input, shape index: {}]   ;;  %s806_s1 = inlined_call_operand.hbm [shape: f32[16,128], index: 1, kind: input, shape index: {}]   ;;  %s807_s2 = inlined_call_operand.vmem [shape: f32[1,128], index: 2, kind: input, shape index: {}]   ;;  %s808_s3 = inlined_call_operand.hbm [shape: f32[2,8,128], index: 3, kind: output, shape index: {}]  }
   0x1   :  { %10 = vsyncpa [#allocation3 + $0x1], 0 }
   0x2   :  { %11 = vsyncpa [#allocation6], 0 }
   0x3   :  { %13 = vsyncpa [#allocation6 + $0x1], 0 }
   0x4   :  { %14 = vsyncpa [#allocation4], 0 }
   0x5   :  { %16 = vsyncpa [#allocation4 + $0x1], 0  ;;  %s588_s12 = smov 0   ;;  %s590_s13 = smov 0  }
   0x6   :  { %s592_s14 = smov 0   ;;  %s594_s15 = smov 0  }
   0x7 LB: > { %s609_s16 = sadd.s32 4294967295, %s563_s15   ;;  %s362_s17 = sadd.s32 4294967294, %s563_s15   ;;  %s563_s15 = sphi %s594_s15, %s827_s15   ;;  %s559_s14 = sphi %s592_s14, %s826_s14   ;;  %s555_s13 = sphi %s590_s13, %s825_s13   ;;  %s551_s12 = sphi %s588_s12, %s824_s12  }
   0x8   : > { %s613_s18 = sadd.s32 1, %s563_s15   ;;  %s29_s19 = sadd.s32 1, %s559_s14 }
   0x9   : > { %s26_s20 = ssub.s32 %s563_s15, %s613_s18  ;;  %p36_p0 = scmp.ne.s32.totalorder %s559_s14, %s555_s13 }
   0xa   : > { %p27_p1 = scmp.eq.s32.totalorder %s26_s20, 0  ;;  %p37_p2 = scmp.eq.s32.totalorder %s563_s15, 0 }
   0xb   : > { %p42_p3 = scmp.ne.s32.totalorder %s555_s13, %s551_s12  ;;  %p43_p4 = scmp.eq.s32.totalorder %s609_s16, 0 }
   0xc   : > { %s625_s21 = scalar_select %p27_p1, %s559_s14, %s29_s19  }
   0xd   : > { %p627_p5 = por %p37_p2, %p36_p0  ;;  %p631_p6 = por %p43_p4, %p42_p3 }
   0xe   : > { %p113_p7 = scmp.eq.s32.totalorder %s609_s16, 1  ;;  %p119_p8 = scmp.eq.s32.totalorder %s362_s17, 1 }
   0xf   : > { %s812_s23 = scalar_select %p631_p6, 1, 0 }
  0x10   : > { %p395_p10 = scmp.lt.s32.totalorder %s563_s15, 2  ;;  %p638_p11 = por %p113_p7, %p36_p0 }
  0x11   : > { %p642_p12 = por %p119_p8, %p42_p3  ;;  %s647_s26 = sand.u32 1, %s559_s14  }
  0x12   : > { %s813_s24 = scalar_select %p638_p11, 1, 0 }
  0x13   : > { %s814_s25 = scalar_select %p642_p12, 1, 0 }
  0x14   : > { %s366_s27 = sshll.u32 %s563_s15, 7  ;;  %s365_s28 = sshll.u32 %s647_s26, 3 }
  0x15   : > { %s656_s4 = scalar_lea.hbm %s805_s0, %s366_s27  ;;  %s146_s5 = scalar_lea.vmem [#allocation2], %s365_s28 }
  0x16   : > { %s153_s6 = sshll.u32 %s146_s5, 4  ;;  %p662_p13 = pnand %p395_p10, %p627_p5  ;;  %s666_s6 = int_to_ptr.vmem [resolvable:$true] %s153_s6 }
  0x17   : > { %s143_s8 = scalar_lea.sflag [#allocation3], %s647_s26  ;;  %s433_s9 = scalar_lea.hbm %s656_s4, 128 }
  0x18   : > { %p434_p2 = scmp.ne.s32.totalorder %s656_s4, %s433_s9  ;;  %p435_p3 = pneg %p662_p13 }
  0x19   : > { %s438_s17 = scalar_lea.hbm %s805_s0, 256  ;;  %p439_p5 = scmp.lt.u32.totalorder %s656_s4, %s805_s0 }
  0x1a   : > { %p436_p4 = pnand %p435_p3, %p434_p2  ;;  %p440_p8 = scmp.lt.u32.totalorder %s438_s17, %s433_s9 }
  0x1b   : > { %p442_p9 = scmp.lt.u32.totalorder %s433_s9, %s656_s4 }
  0x1c   : > { %p437_p7 = pneg %p436_p4  ;;  %p441_p10 = por %p440_p8, %p439_p5 }
  0x1e   : > { %p443_p0 = por %p442_p9, %p441_p10 }
  0x20   : > { %p444_p1 = pnand %p443_p0, %p437_p7 }
  0x22   : > { %447 = shalt.err (!%p444_p1)
}
  0x23   : > { %s448_s22 = scalar_lea.vmem %s666_s6, 128  ;;  %s565_s29 = smov [#allocation2]  }
  0x24   : > { %p449_p2 = scmp.ne.s32.totalorder %s666_s6, %s448_s22  ;;  %s453_s30 = sshll.u32 %s565_s29, 4  ;;  %s454_s30 = int_to_ptr.vmem [resolvable:$false] %s453_s30 }
  0x25   : > { %s455_s5 = scalar_lea.vmem %s454_s30, 256  ;;  %p456_p11 = scmp.lt.s32.totalorder %s666_s6, %s454_s30 }
  0x26   : > { %p451_p4 = pnand %p449_p2, %p435_p3  ;;  %p457_p5 = scmp.lt.s32.totalorder %s455_s5, %s448_s22 }
  0x28   : > { %p452_p12 = pneg %p451_p4  ;;  %p458_p8 = por %p457_p5, %p456_p11 }
  0x2a   : > { %p459_p9 = pnand %p458_p8, %p452_p12 }
  0x2c   : > { %462 = shalt.err (!%p459_p9)
}
  0x2d   : > { %387 = dma.hbm_to_vmem [thread:$0]  (!%p662_p13), %s656_s4, 128, %s666_s6, %s143_s8  }
  0x2e   : > { %p816_p0 = scmp.lt.s32.totalorder %s563_s15, 3  ;;  %p817_p1 = scmp.ge.s32.totalorder %s563_s15, 1 }
  0x2f   : > { %s709_s17 = scalar_lea.hbm %s806_s1, %s366_s27  ;;  %s164_s19 = scalar_lea.vmem [#allocation5], %s365_s28 }
  0x30   : > { %p700_p7 = pnand %p817_p1, %p816_p0  ;;  %s171_s20 = sshll.u32 %s164_s19, 4  ;;  %s172_s20 = int_to_ptr.vmem [resolvable:$true] %s171_s20 }
  0x31   : > { %s161_s4 = scalar_lea.sflag [#allocation6], %s647_s26  ;;  %s463_s6 = scalar_lea.hbm %s709_s17, 128 }
  0x32   : > { %s818_s9 = scalar_select %p700_p7, 1, 0 }
  0x33   : > { %p464_p11 = scmp.ne.s32.totalorder %s709_s17, %s463_s6  ;;  %s468_s27 = scalar_lea.hbm %s806_s1, 256 }
  0x34   : > { %p469_p2 = scmp.lt.u32.totalorder %s709_s17, %s806_s1  ;;  %p470_p4 = scmp.lt.u32.totalorder %s468_s27, %s463_s6 }
  0x35   : > { %p466_p12 = pnand %p464_p11, %p435_p3  ;;  %p472_p8 = scmp.lt.u32.totalorder %s463_s6, %s709_s17 }
  0x36   : > { %p471_p5 = por %p470_p4, %p469_p2 }
  0x37   : > { %p467_p10 = pneg %p466_p12 }
  0x38   : > { %p473_p9 = por %p472_p8, %p471_p5 }
  0x3a   : > { %p474_p0 = pnand %p473_p9, %p467_p10 }
  0x3c   : > { %477 = shalt.err (!%p474_p0)
}
  0x3d   : > { %s478_s26 = scalar_lea.vmem %s172_s20, 128  ;;  %s566_s28 = smov [#allocation5]  }
  0x3e   : > { %p479_p1 = scmp.ne.s32.totalorder %s172_s20, %s478_s26  ;;  %s483_s5 = sshll.u32 %s566_s28, 4  ;;  %s484_s5 = int_to_ptr.vmem [resolvable:$false] %s483_s5 }
  0x3f   : > { %s485_s10 = scalar_lea.vmem %s484_s5, 256  ;;  %p486_p6 = scmp.lt.s32.totalorder %s172_s20, %s484_s5 }
  0x40   : > { %p481_p11 = pnand %p479_p1, %p435_p3  ;;  %p487_p7 = scmp.lt.s32.totalorder %s485_s10, %s478_s26 }
  0x42   : > { %p482_p12 = pneg %p481_p11  ;;  %p488_p2 = por %p487_p7, %p486_p6 }
  0x44   : > { %p489_p4 = pnand %p488_p2, %p482_p12 }
  0x46   : > { %492 = shalt.err (!%p489_p4)
}
  0x47   : > { %390 = dma.hbm_to_vmem [thread:$0]  (!%p662_p13), %s709_s17, 128, %s172_s20, %s161_s4  }
  0x48   : > { %p819_p10 = scmp.ne.s32.totalorder %s818_s9, 0 }
  0x49   : > { %s736_s11 = sand.u32 (!%p819_p10), 1, %s555_s13   ;;  %p820_p6 = scmp.ne.s32.totalorder (!%p819_p10), %s812_s23, 0 }
  0x4a   : > { %180 = sbr.rel (%p819_p10) target bundleno = 138 (0x8a), region = 32  ;;  %s739_s19 = sshll.u32 (!%p819_p10), %s736_s11, 3 }
  0x4b   : > { %s183_s6 = scalar_lea.sflag (!%p819_p10), [#allocation3], %s736_s11  ;;  %s186_s8 = scalar_lea.vmem (!%p819_p10), [#allocation2], %s739_s19 }
  0x51   : > { %538 = dma.done.wait (%p820_p6), %s183_s6, 128  }
  0x52   : > { %540 = vsyncadd (%p820_p6), %s183_s6, 4294967168  ;;  %s192_s7 = scalar_lea.sflag [#allocation6], %s736_s11  ;;  %s195_s9 = scalar_lea.vmem [#allocation5], %s739_s19 }
  0x53   : > { %542 = dma.done.wait (%p820_p6), %s192_s7, 128  }
  0x54   : > { %544 = vsyncadd (%p820_p6), %s192_s7, 4294967168  ;;  %v223_v0 = vld [vmem:[%s186_s8] sm:$0xff]  ;;  %v224_v7 = vld [vmem:[%s195_s9] sm:$0xff]  ;;  %s222_s23 = scalar_lea.vmem [#allocation7], %s739_s19  ;;  %s375_s22 = sshll.u32 %s609_s16, 7 }
  0x55   : > { %v226_v1 = vsub.f32 0.0, %v223_v0  ;;  %v373_v8 = vld [vmem:[%s807_s2] ss:$0 sm:$0xff]  ;;  %v249_v15 = vsub.f32 1.0, %v224_v7  ;;  %s269_s4 = sshll.u32 %s222_s23, 4  ;;  %s763_s30 = scalar_lea.hbm %s808_s3, %s375_s22  ;;  %s758_s4 = int_to_ptr.vmem [resolvable:$true] %s269_s4 }
  0x56   : > { %v233_v11 = vmul.f32 %v373_v8, %v224_v7  ;;  %s256_s26 = scalar_lea.sflag [#allocation4], %s736_s11  ;;  %s493_s28 = scalar_lea.vmem %s758_s4, 128 }
  0x57   : > { %v236_v2 = vmin.f32 %v223_v0, %v226_v1  ;;  %v235_v14 = vmax.f32 %v226_v1, 0.0  ;;  %v250_v20 = vmul.f32 %v249_v15, %v223_v0  ;;  %p494_p13 = scmp.ne.s32.totalorder %s758_s4, %s493_s28  ;;  %p821_p3 = scmp.ne.s32.totalorder %s813_s24, 0 }
  0x58   : > { %v234_v17 = vadd.f32 1.0, %v233_v11  ;;  %s567_s16 = smov [#allocation7]  }
  0x59   : > { %v237_v3 = vmul.f32 1.442695, %v236_v2  ;;  %p495_p7 = pnand %p494_p13, %p821_p3  ;;  %s497_s5 = sshll.u32 %s567_s16, 4  ;;  %s498_s5 = int_to_ptr.vmem [resolvable:$false] %s497_s5 }
  0x5a   : > { %s499_s10 = scalar_lea.vmem %s498_s5, 256  ;;  %p500_p8 = scmp.lt.s32.totalorder %s758_s4, %s498_s5 }
  0x5b   : > { %429 = vpow2.f32 %v237_v3  ;;  %p496_p5 = pneg %p495_p7  ;;  %p501_p9 = scmp.lt.s32.totalorder %s499_s10, %s493_s28 }
  0x5d   : > { %p502_p0 = por %p501_p9, %p500_p8 }
  0x5f   : > { %p503_p1 = pnand %p502_p0, %p496_p5 }
  0x65   : > { %v430_v4 = vpop.eup %429 }
  0x66   : > { %v239_v5 = vadd.f32 1.0, %v430_v4  ;;  %v242_v6 = vmul.f32 -0.5, %v430_v4  ;;  %v245_v10 = vand.u32 2147483647, %v430_v4 }
  0x68   : > { %431 = vlog2.f32 %v239_v5  ;;  %v243_v9 = vadd.f32 1.0, %v242_v6  ;;  %vm246_vm0 = vcmp.lt.f32.partialorder %v245_v10, 0.0004427343 }
  0x6a   : > { %v244_v12 = vmul.f32 %v430_v4, %v243_v9 }
  0x72   : > { %v432_v13 = vpop.eup %431 }
  0x73   : > { %v241_v16 = vmul.f32 0.6931472, %v432_v13 }
  0x75   : > { %v247_v18 = vsel %vm246_vm0, %v244_v12, %v241_v16 }
  0x76   : > { %v248_v19 = vadd.f32 %v247_v18, %v235_v14 }
  0x78   : > { %v251_v21 = vmul.f32 %v248_v19, %v234_v17 }
  0x7a   : > { %v252_v22 = vadd.f32 %v251_v21, %v250_v20 }
  0x7c   : > { %254 = vst [vmem:[%s222_s23] sm:$0xff] %v252_v22 }
  0x7d   : > { %506 = shalt.err (!%p503_p1)
}
  0x7e   : > { %s507_s11 = scalar_lea.hbm %s763_s30, 128  ;;  %s511_s8 = scalar_lea.hbm %s808_s3, 256 }
  0x7f   : > { %p508_p11 = scmp.ne.s32.totalorder %s763_s30, %s507_s11  ;;  %p512_p4 = scmp.lt.u32.totalorder %s763_s30, %s808_s3 }
  0x80   : > { %p513_p10 = scmp.lt.u32.totalorder %s511_s8, %s507_s11  ;;  %p515_p13 = scmp.lt.u32.totalorder %s507_s11, %s763_s30 }
  0x81   : > { %p509_p12 = pnand %p508_p11, %p821_p3 }
  0x82   : > { %p514_p6 = por %p513_p10, %p512_p4 }
  0x83   : > { %p510_p2 = pneg %p509_p12 }
  0x84   : > { %p516_p7 = por %p515_p13, %p514_p6 }
  0x86   : > { %p517_p5 = pnand %p516_p7, %p510_p2 }
  0x88   : > { %520 = shalt.err (!%p517_p5)
}
  0x89   : > { %382 = dma.vmem_to_hbm [thread:$0]  (%p821_p3), %s758_s4, 128, %s763_s30, %s256_s26  }
  0x8a PF: > { %s281_s17 = sand.u32 1, %s551_s12   ;;  %p822_p8 = scmp.ne.s32.totalorder %s814_s25, 0 }
  0x8b   : > { %p823_p9 = scmp.ge.s32.totalorder %s563_s15, 2  ;;  %s282_s20 = scalar_lea.sflag [#allocation4], %s281_s17 }
  0x8d   : > { %p392_p0 = pnand %p823_p9, %p822_p8 }
  0x8f   : > { %546 = dma.done.wait (!%p392_p0), %s282_s20, 128  }
  0x90   : > { %548 = vsyncadd (!%p392_p0), %s282_s20, 4294967168  ;;  %p19_p1 = scmp.ge.s32.totalorder %s613_s18, 4   ;;  %s824_s12 = smov %s555_s13 }
  0x91   : > { %s825_s13 = smov %s559_s14  ;;  %s826_s14 = smov %s625_s21 }
  0x92   : > { %s827_s15 = smov %s613_s18  ;;  %21 = sbr.rel (!%p19_p1) target bundleno = 7 (0x7), region = 90 }
  0x99   :  { %287 = vsyncpa [#allocation3], 1 }
  0x9a   :  { %289 = vsyncpa [#allocation3 + $0x1], 1 }
  0x9b   :  { %290 = vsyncpa [#allocation6], 1 }
  0x9c   :  { %292 = vsyncpa [#allocation6 + $0x1], 1 }
  0x9d   :  { %293 = vsyncpa [#allocation4], 1 }
  0x9e   :  { %295 = vsyncpa [#allocation4 + $0x1], 1 }

</bundles_post_ra>
